<compile_context>
chip_gen: v7x
topology: tpu7x:2x2x1
jax: 0.10.0
libtpu: 0.0.40
codegen_flags: <defaults>
</compile_context>

<pallas_src>
import functools

import jax
import jax.numpy as jnp
from jax.experimental import pallas as pl
from jax.experimental.pallas import tpu as pltpu


def _round_up(x, m):
    return (x + m - 1) // m * m


# Per-grid-step overhead (~0.35 us) expressed in "HBM row equivalents" for the
# tile-size cost model below.  Rough, but it balances padding waste vs. step
# overhead correctly at both ends.
_STEP_OVERHEAD_ROWS = 512


def _pick_tb(B, tb_max=1024):
    """Pick the batch tile: minimize (row padding + per-step overhead).

    Keeps the grid at >=2 steps whenever the batch allows it, so the single
    "parallel" grid axis can be sharded across v7x's two TensorCores.
    """
    B8 = _round_up(max(B, 1), 8)
    cands = [c for c in (1024, 512, 256, 128, 64, 32, 16, 8)
             if c <= tb_max and (c < B8 or B8 <= 8)]
    if not cands:
        return B8

    def cost(c):
        steps = -(-B8 // c)
        return (steps * c - B) + _STEP_OVERHEAD_ROWS * steps

    return min(cands, key=cost)


def _leaky_relu(x, alpha=0.2):  # PyTorch module uses nn.LeakyReLU(0.2)
    return jnp.where(x > 0, x, alpha * x)


def vae_kernel(x_ref, eps_ref, w_ref, b_ref, out_ref, eps_pad_ref, *,
               d_in, hid_p, lat, lat_p, out_p):
    """One batch tile of the full VAE forward.

    w_ref: [R, 4*H_p + 2*L_p + Dout_p] concatenated weights (bf16 or f32).
    b_ref: [1, same]                   concatenated biases (f32).
    Column layout: w1 | w2 | wm | wv | dw1 | dw2 | wo  (widths H_p, H_p, L_p,
    L_p, H_p, H_p, Dout_p) — all static 128-multiple offsets.
    """
    o_w1 = 0
    o_w2 = o_w1 + hid_p
    o_mv = o_w2 + hid_p            # fused mean|log_var block, width 2*lat_p
    o_d1 = o_mv + 2 * lat_p
    o_d2 = o_d1 + hid_p
    o_wo = o_d2 + hid_p

    def dense(h, rows, off, cols):
        # Tile-aligned static slices of the resident weight/bias slabs.
        w = w_ref[0:rows, off:off + cols]
        b = b_ref[:, off:off + cols]
        # MXU matmul in the weight dtype, f32 accumulation; bias add and all
        # elementwise epilogues stay f32 (v5e VPU/EUP have no bf16).
        return jnp.dot(h.astype(w_ref.dtype), w,
                       preferred_element_type=jnp.float32) + b

    # ---- Encoder ----
    h1 = _leaky_relu(dense(x_ref[...], d_in, o_w1, hid_p))
    h2 = _leaky_relu(dense(h1, hid_p, o_w2, hid_p))
    mv = dense(h2, hid_p, o_mv, 2 * lat_p)   # fused [tb, 2*L_p] projection
    mean = mv[:, :lat_p]
    log_var = mv[:, lat_p:]

    # ---- Reparameterization: y = mean + exp(0.5 * log_var) * eps ----
    # eps arrives unpadded ([tb, lat]); zero-extend it to lat_p lanes through a
    # tiny VMEM scratch (exact: padded lanes only ever hit zero weight rows).
    if lat < lat_p:
        eps_pad_ref[...] = jnp.zeros_like(eps_pad_ref)
        eps_pad_ref[:, 0:lat] = eps_ref[...]
    else:
        eps_pad_ref[...] = eps_ref[...]
    y = mean + jnp.exp(0.5 * log_var) * eps_pad_ref[...]

    # ---- Decoder ----
    d1 = _leaky_relu(dense(y, lat_p, o_d1, hid_p))
    d2 = _leaky_relu(dense(d1, hid_p, o_d2, hid_p))
    logits = dense(d2, hid_p, o_wo, out_p)

    out_ref[...] = jax.nn.sigmoid(logits).astype(out_ref.dtype)


def vae_forward(x, eps, params, *, tb=None,
                weight_dtype=jnp.bfloat16, out_dtype=jnp.bfloat16):
    """Fused VAE forward. x:[B,D_in], eps:[B,L] -> x_hat:[B,D_out] (out_dtype).

    weight_dtype: bf16 by default (required on v5e to stay memory-bound);
                  f32 is fine on v6e/v7x if tighter accuracy is needed.
    out_dtype:    bf16 halves the writeback stream; use f32 if downstream needs it.
    """
    B, D_in = x.shape
    L = eps.shape[1]
    H = params["w1"].shape[1]
    D_out = params["wo"].shape[1]

    wdt = jnp.dtype(weight_dtype)
    row_align = 16 if wdt == jnp.dtype(jnp.bfloat16) else 8

    # Lane-dense padding for everything that feeds/leaves the MXU on lanes.
    H_p = _round_up(H, 128)
    L_p = _round_up(L, 128)
    D_out_p = _round_up(D_out, 128)
    # Streamed x keeps its natural width, only aligned to the sublane packing
    # of the weight dtype so the w1 row-slice stays tile-aligned (64 -> 64).
    D_in_al = _round_up(D_in, row_align)

    # Batch tile (see _pick_tb); exposed for sweeping.
    if tb is None:
        tb = _pick_tb(B)
    B_p = _round_up(B, tb)

    def padw(a, rows, cols):
        return jnp.pad(a.astype(wdt),
                       ((0, rows - a.shape[0]), (0, cols - a.shape[1])))

    def padb(a, cols):
        return jnp.pad(a.astype(jnp.float32), ((0, 0), (0, cols - a.shape[1])))

    # One resident weight slab + one resident bias slab (2 DMAs instead of 14).
    R = max(D_in_al, H_p, L_p)
    R = _round_up(R, row_align)
    wcat = jnp.concatenate([
        padw(params["w1"], R, H_p),
        padw(params["w2"], R, H_p),
        padw(params["wm"], R, L_p), padw(params["wv"], R, L_p),  # fused mv block
        padw(params["dw1"], R, H_p),
        padw(params["dw2"], R, H_p),
        padw(params["wo"], R, D_out_p),
    ], axis=1)
    bcat = jnp.concatenate([
        padb(params["b1"], H_p), padb(params["b2"], H_p),
        padb(params["bm"], L_p), padb(params["bv"], L_p),
        padb(params["db1"], H_p), padb(params["db2"], H_p),
        padb(params["bo"], D_out_p),
    ], axis=1)

    # Streamed activations: batch-padded only, no lane padding in HBM.
    xp = jnp.pad(x.astype(wdt), ((0, B_p - B), (0, D_in_al - D_in)))
    epsp = jnp.pad(eps.astype(jnp.float32), ((0, B_p - B), (0, 0)))

    grid_spec = pltpu.PrefetchScalarGridSpec(
        num_scalar_prefetch=0,
        grid=(B_p // tb,),
        in_specs=[
            pl.BlockSpec((tb, D_in_al), lambda i: (i, 0)),   # x tile (narrow)
            pl.BlockSpec((tb, L), lambda i: (i, 0)),         # eps tile (narrow)
            # Same full block every step: DMA'd once, VMEM-resident.
            pl.BlockSpec(wcat.shape, lambda i: (0, 0)),
            pl.BlockSpec(bcat.shape, lambda i: (0, 0)),
        ],
        out_specs=pl.BlockSpec((tb, D_out_p), lambda i: (i, 0)),
        scratch_shapes=[pltpu.VMEM((tb, L_p), jnp.float32)],  # eps lane-pad buffer
    )

    flops = 2 * B_p * (D_in_al * H_p + H_p * H_p + H_p * 2 * L_p
                       + L_p * H_p + H_p * H_p + H_p * D_out_p)
    transcendentals = B_p * (L_p + D_out_p)                   # exp + sigmoid
    bytes_accessed = (int(wcat.size) * wcat.dtype.itemsize
                      + int(bcat.size) * 4
                      + int(xp.size) * xp.dtype.itemsize
                      + int(epsp.size) * 4
                      + B_p * D_out_p * jnp.dtype(out_dtype).itemsize)

    fn = pl.pallas_call(
        functools.partial(vae_kernel, d_in=D_in_al, hid_p=H_p, lat=L,
                          lat_p=L_p, out_p=D_out_p),
        out_shape=jax.ShapeDtypeStruct((B_p, D_out_p), jnp.dtype(out_dtype)),
        grid_spec=grid_spec,
        compiler_params=pltpu.CompilerParams(
            dimension_semantics=("parallel",)),
        cost_estimate=pl.CostEstimate(
            flops=int(flops),
            transcendentals=int(transcendentals),
            bytes_accessed=int(bytes_accessed)),
    )
    out = fn(xp, epsp, wcat, bcat)
    return out[:B, :D_out]


def make_params(key, input_dim, hidden_dim, latent_dim, output_dim):
    """Deterministic synthetic parameters (shapes match the PyTorch module)."""
    ks = jax.random.split(key, 14)
    s = 0.1

    def w(k, shape):
        return (s * jax.random.normal(k, shape)).astype(jnp.float32)

    return {
        # Encoder
        "w1": w(ks[0], (input_dim, hidden_dim)),  "b1": w(ks[1], (1, hidden_dim)),
        "w2": w(ks[2], (hidden_dim, hidden_dim)), "b2": w(ks[3], (1, hidden_dim)),
        "wm": w(ks[4], (hidden_dim, latent_dim)), "bm": w(ks[5], (1, latent_dim)),
        "wv": w(ks[6], (hidden_dim, latent_dim)), "bv": w(ks[7], (1, latent_dim)),
        # Decoder
        "dw1": w(ks[8], (latent_dim, hidden_dim)),  "db1": w(ks[9], (1, hidden_dim)),
        "dw2": w(ks[10], (hidden_dim, hidden_dim)), "db2": w(ks[11], (1, hidden_dim)),
        "wo": w(ks[12], (hidden_dim, output_dim)),  "bo": w(ks[13], (1, output_dim)),
    }


def vae_reference(x, eps, p):
    """Pure-JAX f32 reference mirroring the PyTorch forward."""
    h1 = _leaky_relu(x @ p["w1"] + p["b1"])
    h2 = _leaky_relu(h1 @ p["w2"] + p["b2"])
    mean = h2 @ p["wm"] + p["bm"]
    log_var = h2 @ p["wv"] + p["bv"]
    y = mean + jnp.exp(0.5 * log_var) * eps
    d1 = _leaky_relu(y @ p["dw1"] + p["db1"])
    d2 = _leaky_relu(d1 @ p["dw2"] + p["db2"])
    return jax.nn.sigmoid(d2 @ p["wo"] + p["bo"])


if __name__ == "__main__":
    # Small shapes implied by the forward pass of this MLP VAE.
    B, INPUT_DIM, HIDDEN_DIM, LATENT_DIM = 8, 64, 32, 16
    OUTPUT_DIM = INPUT_DIM

    key = jax.random.PRNGKey(0)
    k_x, k_eps, k_par = jax.random.split(key, 3)

    x = jax.random.uniform(k_x, (B, INPUT_DIM), dtype=jnp.float32)
    # torch.randn_like(var) reparameterization noise, generated deterministically
    # on the host and passed into the kernel.
    eps = jax.random.normal(k_eps, (B, LATENT_DIM), dtype=jnp.float32)
    params = make_params(k_par, INPUT_DIM, HIDDEN_DIM, LATENT_DIM, OUTPUT_DIM)

    x_hat = vae_forward(x, eps, params)
    jax.block_until_ready(x_hat)

    ref = vae_reference(x, eps, params)
    assert x_hat.shape == (B, OUTPUT_DIM)
    # bf16 weight/activation streaming + bf16 output -> compare against the f32
    # reference with a tolerance that is still tight for sigmoid outputs in [0,1].
    err = float(jnp.max(jnp.abs(x_hat.astype(jnp.float32) - ref)))
    assert jnp.allclose(x_hat.astype(jnp.float32), ref, atol=3e-2, rtol=3e-2), err

    print("KERNEL_OK")
</pallas_src>

<mosaic_0001>
module attributes {stable_mosaic.version = 11 : i64} {
  func.func @vae_kernel(%arg0: i32, %arg1: memref<8x64xbf16, #tpu.memory_space<vmem>>, %arg2: memref<8x16xf32, #tpu.memory_space<vmem>>, %arg3: memref<128x896xbf16, #tpu.memory_space<vmem>>, %arg4: memref<1x896xf32, #tpu.memory_space<vmem>>, %arg5: memref<8x128xbf16, #tpu.memory_space<vmem>>, %arg6: memref<8x128xf32, #tpu.memory_space<vmem>>) attributes {dimension_semantics = [#tpu.dimension_semantics<parallel>], iteration_bounds = array<i64: 1>, scalar_prefetch = 0 : i64, scratch_operands = 1 : i64, tpu.core_type = #tpu.core_type<tc>, window_params = [{transform_indices = @transform_0, window_bounds = array<i64: 8, 64>}, {transform_indices = @transform_1, window_bounds = array<i64: 8, 16>}, {pipeline_mode = #tpu.pipeline_mode<synchronous>, transform_indices = @transform_2, window_bounds = array<i64: 128, 896>}, {pipeline_mode = #tpu.pipeline_mode<synchronous>, transform_indices = @transform_3, window_bounds = array<i64: 1, 896>}, {transform_indices = @transform_4, window_bounds = array<i64: 8, 128>}]} {
    %c0 = arith.constant 0 : index
    %c0_0 = arith.constant 0 : index
    %0 = vector.load %arg1[%c0, %c0_0] : memref<8x64xbf16, #tpu.memory_space<vmem>>, vector<8x64xbf16>
    %c0_1 = arith.constant 0 : index
    %c0_2 = arith.constant 0 : index
    %1 = vector.load %arg3[%c0_1, %c0_2] : memref<128x896xbf16, #tpu.memory_space<vmem>>, vector<64x128xbf16>
    %c0_3 = arith.constant 0 : index
    %c0_4 = arith.constant 0 : index
    %2 = vector.load %arg4[%c0_3, %c0_4] : memref<1x896xf32, #tpu.memory_space<vmem>>, vector<1x128xf32>
    %cst = arith.constant dense<0.000000e+00> : vector<8x128xf32>
    %3 = tpu.matmul %0, %1, %cst {dimension_numbers = #tpu.dot_dimension_numbers<[1], [0], [0], [1], [0, 0, 1, 1], [], []>} : vector<8x64xbf16>, vector<64x128xbf16>, vector<8x128xf32> -> vector<8x128xf32>
    %4 = vector.broadcast %2 : vector<1x128xf32> to vector<8x128xf32>
    %5 = arith.addf %3, %4 : vector<8x128xf32>
    %cst_5 = arith.constant 0.000000e+00 : f32
    %6 = vector.broadcast %cst_5 : f32 to vector<8x128xf32>
    %7 = arith.cmpf ogt, %5, %6 : vector<8x128xf32>
    %cst_6 = arith.constant 2.000000e-01 : f32
    %8 = vector.broadcast %cst_6 : f32 to vector<8x128xf32>
    %9 = arith.mulf %8, %5 : vector<8x128xf32>
    %10 = arith.select %7, %5, %9 : vector<8x128xi1>, vector<8x128xf32>
    %c0_7 = arith.constant 0 : index
    %c128 = arith.constant 128 : index
    %11 = vector.load %arg3[%c0_7, %c128] : memref<128x896xbf16, #tpu.memory_space<vmem>>, vector<128x128xbf16>
    %c0_8 = arith.constant 0 : index
    %c128_9 = arith.constant 128 : index
    %12 = vector.load %arg4[%c0_8, %c128_9] : memref<1x896xf32, #tpu.memory_space<vmem>>, vector<1x128xf32>
    %13 = arith.truncf %10 : vector<8x128xf32> to vector<8x128xbf16>
    %cst_10 = arith.constant dense<0.000000e+00> : vector<8x128xf32>
    %14 = tpu.matmul %13, %11, %cst_10 {dimension_numbers = #tpu.dot_dimension_numbers<[1], [0], [0], [1], [0, 0, 1, 1], [], []>} : vector<8x128xbf16>, vector<128x128xbf16>, vector<8x128xf32> -> vector<8x128xf32>
    %15 = vector.broadcast %12 : vector<1x128xf32> to vector<8x128xf32>
    %16 = arith.addf %14, %15 : vector<8x128xf32>
    %cst_11 = arith.constant 0.000000e+00 : f32
    %17 = vector.broadcast %cst_11 : f32 to vector<8x128xf32>
    %18 = arith.cmpf ogt, %16, %17 : vector<8x128xf32>
    %cst_12 = arith.constant 2.000000e-01 : f32
    %19 = vector.broadcast %cst_12 : f32 to vector<8x128xf32>
    %20 = arith.mulf %19, %16 : vector<8x128xf32>
    %21 = arith.select %18, %16, %20 : vector<8x128xi1>, vector<8x128xf32>
    %c0_13 = arith.constant 0 : index
    %c256 = arith.constant 256 : index
    %22 = vector.load %arg3[%c0_13, %c256] : memref<128x896xbf16, #tpu.memory_space<vmem>>, vector<128x256xbf16>
    %c0_14 = arith.constant 0 : index
    %c256_15 = arith.constant 256 : index
    %23 = vector.load %arg4[%c0_14, %c256_15] : memref<1x896xf32, #tpu.memory_space<vmem>>, vector<1x256xf32>
    %24 = arith.truncf %21 : vector<8x128xf32> to vector<8x128xbf16>
    %cst_16 = arith.constant dense<0.000000e+00> : vector<8x256xf32>
    %25 = tpu.matmul %24, %22, %cst_16 {dimension_numbers = #tpu.dot_dimension_numbers<[1], [0], [0], [1], [0, 0, 1, 1], [], []>} : vector<8x128xbf16>, vector<128x256xbf16>, vector<8x256xf32> -> vector<8x256xf32>
    %26 = vector.broadcast %23 : vector<1x256xf32> to vector<8x256xf32>
    %27 = arith.addf %25, %26 : vector<8x256xf32>
    %28 = vector.extract_strided_slice %27 {offsets = [0, 0], sizes = [8, 128], strides = [1, 1]} : vector<8x256xf32> to vector<8x128xf32>
    %29 = vector.extract_strided_slice %27 {offsets = [0, 128], sizes = [8, 128], strides = [1, 1]} : vector<8x256xf32> to vector<8x128xf32>
    %cst_17 = arith.constant 0.000000e+00 : f32
    %30 = vector.broadcast %cst_17 : f32 to vector<8x128xf32>
    %c0_18 = arith.constant 0 : index
    %c0_19 = arith.constant 0 : index
    %31 = vector.load %arg6[%c0_18, %c0_19] : memref<8x128xf32, #tpu.memory_space<vmem>>, vector<8x128xf32>
    tpu.vector_store %arg6[%c0_18, %c0_19], %30 {strides = array<i32>} : memref<8x128xf32, #tpu.memory_space<vmem>>, vector<8x128xf32>,
    %c0_20 = arith.constant 0 : index
    %c0_21 = arith.constant 0 : index
    %32 = vector.load %arg2[%c0_20, %c0_21] : memref<8x16xf32, #tpu.memory_space<vmem>>, vector<8x16xf32>
    %c0_22 = arith.constant 0 : index
    %c0_23 = arith.constant 0 : index
    %33 = vector.load %arg6[%c0_22, %c0_23] : memref<8x128xf32, #tpu.memory_space<vmem>>, vector<8x16xf32>
    tpu.vector_store %arg6[%c0_22, %c0_23], %32 {strides = array<i32>} : memref<8x128xf32, #tpu.memory_space<vmem>>, vector<8x16xf32>,
    %cst_24 = arith.constant 5.000000e-01 : f32
    %34 = vector.broadcast %cst_24 : f32 to vector<8x128xf32>
    %35 = arith.mulf %34, %29 : vector<8x128xf32>
    %36 = math.exp %35 : vector<8x128xf32>
    %c0_25 = arith.constant 0 : index
    %c0_26 = arith.constant 0 : index
    %37 = vector.load %arg6[%c0_25, %c0_26] : memref<8x128xf32, #tpu.memory_space<vmem>>, vector<8x128xf32>
    %38 = arith.mulf %36, %37 : vector<8x128xf32>
    %39 = arith.addf %28, %38 : vector<8x128xf32>
    %c0_27 = arith.constant 0 : index
    %c512 = arith.constant 512 : index
    %40 = vector.load %arg3[%c0_27, %c512] : memref<128x896xbf16, #tpu.memory_space<vmem>>, vector<128x128xbf16>
    %c0_28 = arith.constant 0 : index
    %c512_29 = arith.constant 512 : index
    %41 = vector.load %arg4[%c0_28, %c512_29] : memref<1x896xf32, #tpu.memory_space<vmem>>, vector<1x128xf32>
    %42 = arith.truncf %39 : vector<8x128xf32> to vector<8x128xbf16>
    %cst_30 = arith.constant dense<0.000000e+00> : vector<8x128xf32>
    %43 = tpu.matmul %42, %40, %cst_30 {dimension_numbers = #tpu.dot_dimension_numbers<[1], [0], [0], [1], [0, 0, 1, 1], [], []>} : vector<8x128xbf16>, vector<128x128xbf16>, vector<8x128xf32> -> vector<8x128xf32>
    %44 = vector.broadcast %41 : vector<1x128xf32> to vector<8x128xf32>
    %45 = arith.addf %43, %44 : vector<8x128xf32>
    %cst_31 = arith.constant 0.000000e+00 : f32
    %46 = vector.broadcast %cst_31 : f32 to vector<8x128xf32>
    %47 = arith.cmpf ogt, %45, %46 : vector<8x128xf32>
    %cst_32 = arith.constant 2.000000e-01 : f32
    %48 = vector.broadcast %cst_32 : f32 to vector<8x128xf32>
    %49 = arith.mulf %48, %45 : vector<8x128xf32>
    %50 = arith.select %47, %45, %49 : vector<8x128xi1>, vector<8x128xf32>
    %c0_33 = arith.constant 0 : index
    %c640 = arith.constant 640 : index
    %51 = vector.load %arg3[%c0_33, %c640] : memref<128x896xbf16, #tpu.memory_space<vmem>>, vector<128x128xbf16>
    %c0_34 = arith.constant 0 : index
    %c640_35 = arith.constant 640 : index
    %52 = vector.load %arg4[%c0_34, %c640_35] : memref<1x896xf32, #tpu.memory_space<vmem>>, vector<1x128xf32>
    %53 = arith.truncf %50 : vector<8x128xf32> to vector<8x128xbf16>
    %cst_36 = arith.constant dense<0.000000e+00> : vector<8x128xf32>
    %54 = tpu.matmul %53, %51, %cst_36 {dimension_numbers = #tpu.dot_dimension_numbers<[1], [0], [0], [1], [0, 0, 1, 1], [], []>} : vector<8x128xbf16>, vector<128x128xbf16>, vector<8x128xf32> -> vector<8x128xf32>
    %55 = vector.broadcast %52 : vector<1x128xf32> to vector<8x128xf32>
    %56 = arith.addf %54, %55 : vector<8x128xf32>
    %cst_37 = arith.constant 0.000000e+00 : f32
    %57 = vector.broadcast %cst_37 : f32 to vector<8x128xf32>
    %58 = arith.cmpf ogt, %56, %57 : vector<8x128xf32>
    %cst_38 = arith.constant 2.000000e-01 : f32
    %59 = vector.broadcast %cst_38 : f32 to vector<8x128xf32>
    %60 = arith.mulf %59, %56 : vector<8x128xf32>
    %61 = arith.select %58, %56, %60 : vector<8x128xi1>, vector<8x128xf32>
    %c0_39 = arith.constant 0 : index
    %c768 = arith.constant 768 : index
    %62 = vector.load %arg3[%c0_39, %c768] : memref<128x896xbf16, #tpu.memory_space<vmem>>, vector<128x128xbf16>
    %c0_40 = arith.constant 0 : index
    %c768_41 = arith.constant 768 : index
    %63 = vector.load %arg4[%c0_40, %c768_41] : memref<1x896xf32, #tpu.memory_space<vmem>>, vector<1x128xf32>
    %64 = arith.truncf %61 : vector<8x128xf32> to vector<8x128xbf16>
    %cst_42 = arith.constant dense<0.000000e+00> : vector<8x128xf32>
    %65 = tpu.matmul %64, %62, %cst_42 {dimension_numbers = #tpu.dot_dimension_numbers<[1], [0], [0], [1], [0, 0, 1, 1], [], []>} : vector<8x128xbf16>, vector<128x128xbf16>, vector<8x128xf32> -> vector<8x128xf32>
    %66 = vector.broadcast %63 : vector<1x128xf32> to vector<8x128xf32>
    %67 = arith.addf %65, %66 : vector<8x128xf32>
    %68 = arith.negf %67 : vector<8x128xf32>
    %69 = math.exp %68 : vector<8x128xf32>
    %cst_43 = arith.constant 1.000000e+00 : f32
    %70 = vector.broadcast %cst_43 : f32 to vector<8x128xf32>
    %71 = arith.addf %70, %69 : vector<8x128xf32>
    %72 = arith.divf %70, %71 : vector<8x128xf32>
    %73 = arith.truncf %72 : vector<8x128xf32> to vector<8x128xbf16>
    %c0_44 = arith.constant 0 : index
    %c0_45 = arith.constant 0 : index
    %74 = vector.load %arg5[%c0_44, %c0_45] : memref<8x128xbf16, #tpu.memory_space<vmem>>, vector<8x128xbf16>
    tpu.vector_store %arg5[%c0_44, %c0_45], %73 {strides = array<i32>} : memref<8x128xbf16, #tpu.memory_space<vmem>>, vector<8x128xbf16>,
    return
  }
  func.func @transform_0(%arg0: i32) -> (i32, i32) {
    %c0_i32 = arith.constant 0 : i32
    %c0_i32_0 = arith.constant 0 : i32
    return %arg0, %c0_i32 : i32, i32
  }
  func.func @transform_1(%arg0: i32) -> (i32, i32) {
    %c0_i32 = arith.constant 0 : i32
    %c0_i32_0 = arith.constant 0 : i32
    return %arg0, %c0_i32 : i32, i32
  }
  func.func @transform_2(%arg0: i32) -> (i32, i32) {
    %c0_i32 = arith.constant 0 : i32
    %c0_i32_0 = arith.constant 0 : i32
    %c0_i32_1 = arith.constant 0 : i32
    return %c0_i32, %c0_i32_0 : i32, i32
  }
  func.func @transform_3(%arg0: i32) -> (i32, i32) {
    %c0_i32 = arith.constant 0 : i32
    %c0_i32_0 = arith.constant 0 : i32
    %c0_i32_1 = arith.constant 0 : i32
    return %c0_i32, %c0_i32_0 : i32, i32
  }
  func.func @transform_4(%arg0: i32) -> (i32, i32) {
    %c0_i32 = arith.constant 0 : i32
    %c0_i32_0 = arith.constant 0 : i32
    return %arg0, %c0_i32 : i32, i32
  }
}

</mosaic_0001>

<bundles_post_ra>
// kernel: tpu_custom_call.1
= control target key start
LH: loop header
LB: loop body
LE: loop exit
PB: predicated region body
PF: predicated region fallthrough
CT: control target
= control target key end

     0   :  { %9 = vsyncpa [#allocation4], 0  ;;  %s1292_s0 = inlined_call_operand.hbm [shape: bf16[8,64], index: 0, kind: input, shape index: {}]   ;;  %s1293_s1 = inlined_call_operand.hbm [shape: f32[8,16], index: 1, kind: input, shape index: {}]   ;;  %s1294_s2 = inlined_call_operand.hbm [shape: bf16[128,896], index: 2, kind: input, shape index: {}]   ;;  %s1295_s3 = inlined_call_operand.vmem [shape: f32[1,896], index: 3, kind: input, shape index: {}]   ;;  %s1296_s4 = inlined_call_operand.hbm [shape: bf16[8,128], index: 4, kind: output, shape index: {}]  }
   0x1   :  { %10 = vsyncpa [#allocation7], 0 }
   0x2   :  { %11 = vsyncpa [#allocation5], 0  ;;  %s1145_s15 = smov [#allocation6]   ;;  %s1146_s17 = smov [#allocation3]  }
   0x3   :  { %s28_s16 = sshll.u32 %s1145_s15, 4  ;;  %s18_s18 = sshll.u32 %s1146_s17, 4  ;;  %s29_s16 = int_to_ptr.vmem [resolvable:$true] %s28_s16  ;;  %s19_s18 = int_to_ptr.vmem [resolvable:$true] %s18_s18 }
   0x4   :  { %s1051_s21 = scalar_lea.hbm %s1293_s1, 128 }
   0x5   :  { %p1052_p0 = scmp.ne.s32.totalorder %s1293_s1, %s1051_s21  ;;  %p1055_p1 = scmp.lt.u32.totalorder %s1051_s21, %s1293_s1 }
   0x7   :  { %p1057_p2 = pnand %p1055_p1, %p1052_p0 }
   0x9   :  { %1060 = shalt.err (!%p1057_p2)
}
   0xa   :  { %s1061_s26 = scalar_lea.vmem %s29_s16, 128  ;;  %p1066_p4 = scmp.lt.s32.totalorder %s29_s16, %s29_s16 }
   0xb   :  { %p1062_p3 = scmp.ne.s32.totalorder %s29_s16, %s1061_s26  ;;  %p1067_p5 = scmp.lt.s32.totalorder %s1061_s26, %s1061_s26 }
   0xd   :  { %p1068_p6 = por %p1067_p5, %p1066_p4 }
   0xf   :  { %p1069_p7 = pnand %p1068_p6, %p1062_p3 }
  0x11   :  { %1072 = shalt.err (!%p1069_p7)
}
  0x12   :  { %31 = dma.hbm_to_vmem [thread:$0]  %s1293_s1, 128, %s29_s16, [#allocation7]  }
  0x13   :  { %s1073_s5 = scalar_lea.hbm %s1292_s0, 64 }
  0x14   :  { %p1074_p8 = scmp.ne.s32.totalorder %s1292_s0, %s1073_s5  ;;  %p1077_p9 = scmp.lt.u32.totalorder %s1073_s5, %s1292_s0 }
  0x16   :  { %p1079_p10 = pnand %p1077_p9, %p1074_p8 }
  0x18   :  { %1082 = shalt.err (!%p1079_p10)
}
  0x19   :  { %s1083_s10 = scalar_lea.vmem %s19_s18, 64  ;;  %p1088_p12 = scmp.lt.s32.totalorder %s19_s18, %s19_s18 }
  0x1a   :  { %p1084_p11 = scmp.ne.s32.totalorder %s19_s18, %s1083_s10  ;;  %p1089_p13 = scmp.lt.s32.totalorder %s1083_s10, %s1083_s10 }
  0x1c   :  { %p1090_p0 = por %p1089_p13, %p1088_p12 }
  0x1e   :  { %p1091_p1 = pnand %p1090_p0, %p1084_p11 }
  0x20   :  { %1094 = shalt.err (!%p1091_p1)
}
  0x21   :  { %21 = dma.hbm_to_vmem [thread:$0]  %s1292_s0, 64, %s19_s18, [#allocation4]  }
  0x22   :  { %s1147_s12 = smov [#allocation8]   ;;  %s1095_s16 = scalar_lea.hbm %s1294_s2, 7168 }
  0x23   :  { %s37_s13 = sshll.u32 %s1147_s12, 4  ;;  %p1096_p2 = scmp.ne.s32.totalorder %s1294_s2, %s1095_s16  ;;  %s38_s13 = int_to_ptr.vmem [resolvable:$true] %s37_s13 }
  0x24   :  { %p1099_p3 = scmp.lt.u32.totalorder %s1095_s16, %s1294_s2 }
  0x26   :  { %p1101_p4 = pnand %p1099_p3, %p1096_p2 }
  0x28   :  { %1104 = shalt.err (!%p1101_p4)
}
  0x29   :  { %s1105_s22 = scalar_lea.vmem %s38_s13, 7168  ;;  %p1110_p6 = scmp.lt.s32.totalorder %s38_s13, %s38_s13 }
  0x2a   :  { %p1106_p5 = scmp.ne.s32.totalorder %s38_s13, %s1105_s22  ;;  %p1111_p7 = scmp.lt.s32.totalorder %s1105_s22, %s1105_s22 }
  0x2c   :  { %p1112_p8 = por %p1111_p7, %p1110_p6 }
  0x2e   :  { %p1113_p9 = pnand %p1112_p8, %p1106_p5 }
  0x30   :  { %1116 = shalt.err (!%p1113_p9)
}
  0x31   :  { %s1148_s0 = smov 448   ;;  %s1149_s18 = smov 28  }
  0x32   :  { %43 = dma.hbm_to_vmem [thread:$0]  %s1294_s2, 7168, %s38_s13, [#allocation7], %s1148_s0, %s1148_s0, %s1149_s18  }
  0x33   :  { %1139 = dma.done.wait [#allocation4], 64  }
  0x34   :  { %1140 = vsyncadd [#allocation4], 4294967232 }
  0x35   :  { %1141 = dma.done.wait [#allocation7], 7296  }
  0x36   :  { %1142 = vsyncadd [#allocation7], 4294960000  ;;  %v1150_v0 = vmov 0.0   ;;  %vm1151_vm0 = vmmov 0   ;;  %v985_v1 = vld [vmem:[#allocation8] ss:$28 sps:$4 sm:$0xff]  }
  0x37   :  { %884 = vmatprep.subr.bf16.mxu0 %v1150_v0  ;;  %408 = vst [vmem:[#allocation2] sm:$0xff] %v1150_v0  ;;  %892 = vmatprep.mubr.msk.bf16.mxu0 %vm1151_vm0, %v1150_v0  ;;  %v986_v2 = vld [vmem:[#allocation8 + $0x38] ss:$28 sps:$4 sm:$0xff]   ;;  %v989_v3 = vld [vmem:[#allocation8 + $0x4] ss:$28 sps:$4 sm:$0xff]   ;;  %vm96_vm1 = vcmask 523264  }
  0x38   :  { %896 = vmatprep.subr.bf16.mxu1 %v1150_v0  ;;  %912 = vmatprep.mubr.msk.bf16.mxu1 %vm1151_vm0, %v1150_v0  ;;  %v987_v4 = vld [vmem:[#allocation8 + $0x70] ss:$28 sps:$4 sm:$0xff]   ;;  %v990_v5 = vld [vmem:[#allocation8 + $0x3c] ss:$28 sps:$4 sm:$0xff]   ;;  %v988_v6 = vld [vmem:[#allocation8 + $0xa8] ss:$28 sps:$4 sm:$0xff]  }
  0x39   :  { %885 = vmatpush3.bf16.msra.mxu0 %v985_v1  ;;  %897 = vmatpush3.bf16.msra.mxu1 %v989_v3  ;;  %v991_v7 = vld [vmem:[#allocation8 + $0x74] ss:$28 sps:$4 sm:$0xff]   ;;  %v992_v9 = vld [vmem:[#allocation8 + $0xac] ss:$28 sps:$4 sm:$0xff]   ;;  %v993_v10 = vld [vmem:[#allocation8 + $0xe4] ss:$28 sps:$4 sm:$0xff]   ;;  %v277_v1 = vlaneseq }
  0x3a   :  { %886 = vmatprep.subr.bf16.mxu0 %v1150_v0  ;;  %898 = vmatprep.subr.bf16.mxu1 %v1150_v0  ;;  %v56_v8 = vld [vmem:[#allocation3] sm:$0xf]  ;;  %v994_v11 = vld [vmem:[#allocation8 + $0x11c] ss:$28 sps:$4 sm:$0xff]   ;;  %v996_v13 = vld [vmem:[#allocation8 + $0x18c] ss:$28 sps:$4 sm:$0xff]  }
  0x3b   :  { %v995_v12 = vld [vmem:[#allocation8 + $0x154] ss:$28 sps:$4 sm:$0xff]   ;;  %v997_v14 = vld [vmem:[#allocation8 + $0x8] ss:$28 sps:$4 sm:$0xff]   ;;  %v1000_v17 = vld [vmem:[#allocation8 + $0x40] ss:$28 sps:$4 sm:$0xff]  }
  0x3c   :  { %v999_v15 = vld [vmem:[#allocation8 + $0xc] ss:$28 sps:$4 sm:$0xff]   ;;  %v1002_v16 = vld [vmem:[#allocation8 + $0x44] ss:$28 sps:$4 sm:$0xff]   ;;  %v1005_v18 = vld [vmem:[#allocation8 + $0x7c] ss:$28 sps:$4 sm:$0xff]  }
  0x3d   :  { %887 = vmatpush3.bf16.msra.mxu0 %v986_v2  ;;  %899 = vmatpush3.bf16.msra.mxu1 %v990_v5  ;;  %v1003_v19 = vld [vmem:[#allocation8 + $0x78] ss:$28 sps:$4 sm:$0xff]   ;;  %v1006_v21 = vld [vmem:[#allocation8 + $0xb0] ss:$28 sps:$4 sm:$0xff]   ;;  %v1009_v23 = vld [vmem:[#allocation8 + $0xe8] ss:$28 sps:$4 sm:$0xff]  }
  0x3e   :  { %888 = vmatprep.subr.bf16.mxu0 %v1150_v0  ;;  %900 = vmatprep.subr.bf16.mxu1 %v1150_v0  ;;  %v1008_v20 = vld [vmem:[#allocation8 + $0xb4] ss:$28 sps:$4 sm:$0xff]   ;;  %v1011_v22 = vld [vmem:[#allocation8 + $0xec] ss:$28 sps:$4 sm:$0xff]   ;;  %v1014_v24 = vld [vmem:[#allocation8 + $0x124] ss:$28 sps:$4 sm:$0xff]  }
  0x3f   :  { %v1012_v25 = vld [vmem:[#allocation8 + $0x120] ss:$28 sps:$4 sm:$0xff]   ;;  %v784_v26 = vld [vmem:[%s1295_s3] ss:$0 sm:$0xff]  ;;  %v1015_v36 = vld [vmem:[#allocation8 + $0x158] ss:$28 sps:$4 sm:$0xff]  }
  0x40   :  { %v1017_v35 = vld [vmem:[#allocation8 + $0x15c] ss:$28 sps:$4 sm:$0xff]   ;;  %v1020_v37 = vld [vmem:[#allocation8 + $0x194] ss:$28 sps:$4 sm:$0xff]   ;;  %v1152_v39 = vmov 0   ;;  %vm410_vm4 = vcmask 130048  }
  0x41   :  { %889 = vmatpush3.bf16.msra.mxu0 %v987_v4  ;;  %901 = vmatpush3.bf16.msra.mxu1 %v991_v7  ;;  %v1018_v38 = vld [vmem:[#allocation8 + $0x190] ss:$28 sps:$4 sm:$0xff]   ;;  %v1022_v41 = vld [vmem:[#allocation8 + $0x48] ss:$28 sps:$4 sm:$0xff]   ;;  %v1023_v51 = vld [vmem:[#allocation8 + $0x80] ss:$28 sps:$4 sm:$0xff]  }
  0x42   :  { %890 = vmatprep.subr.bf16.mxu0 %v1150_v0  ;;  %902 = vmatprep.subr.bf16.mxu1 %v1150_v0  ;;  %v1021_v40 = vld [vmem:[#allocation8 + $0x10] ss:$28 sps:$4 sm:$0xff]   ;;  %v790_v42 = vld [vmem:[%s1295_s3 + $0x1] ss:$0 sm:$0xff]  ;;  %v1024_v52 = vld [vmem:[#allocation8 + $0xb8] ss:$28 sps:$4 sm:$0xff]  }
  0x43   :  { %v1025_v53 = vld [vmem:[#allocation8 + $0xf0] ss:$28 sps:$4 sm:$0xff]   ;;  %v409_v54 = vld [vmem:[#allocation6] sm:$0xff]  ;;  %v1026_v55 = vld [vmem:[#allocation8 + $0x128] ss:$28 sps:$4 sm:$0xff]   ;;  %v278_v2 = vshrl.u32 %v277_v1, 7 }
  0x44   :  { %411 = vst.msk [vmem:[#allocation2] sm:$0xff] %vm410_vm4, %v409_v54  ;;  %v1027_v56 = vld [vmem:[#allocation8 + $0x160] ss:$28 sps:$4 sm:$0xff]   ;;  %v1028_v57 = vld [vmem:[#allocation8 + $0x198] ss:$28 sps:$4 sm:$0xff]   ;;  %s1153_s10 = smov [#allocation9]  }
  0x45   :  { %891 = vmatpush3.bf16.msra.mxu0 %v988_v6  ;;  %903 = vmatpush3.bf16.msra.mxu1 %v992_v9  ;;  %v1029_v58 = vld [vmem:[#allocation8 + $0x14] ss:$28 sps:$4 sm:$0xff]   ;;  %v1030_v59 = vld [vmem:[#allocation8 + $0x4c] ss:$28 sps:$4 sm:$0xff]   ;;  %v1031_v60 = vld [vmem:[#allocation8 + $0x84] ss:$28 sps:$4 sm:$0xff]  }
  0x46   :  { %904 = vmatprep.subr.bf16.mxu1 %v1150_v0  ;;  %367 = vmatprep.subr.bf16.mxu0 %v999_v15  ;;  %v1032_v61 = vld [vmem:[#allocation8 + $0xbc] ss:$28 sps:$4 sm:$0xff]   ;;  %v1033_v62 = vld [vmem:[#allocation8 + $0xf4] ss:$28 sps:$4 sm:$0xff]   ;;  %v1034_v63 = vld [vmem:[#allocation8 + $0x12c] ss:$28 sps:$4 sm:$0xff]  }
  0x47   :  { %v283_v3 = vsub.s32 1, %v278_v2  ;;  %v274_v4 = vld [vmem:[%s1295_s3 + $0x2] sm:$0x3]  ;;  %s774_s1 = sshll.u32 %s1153_s10, 4  ;;  %s775_s1 = int_to_ptr.vmem [resolvable:$true] %s774_s1 }
  0x48   :  { %893 = vmatmul.mubr.msk.bf16.vlgmr.msra.gmra.mrb[0].mxu0 %vm96_vm1, %v56_v8  ;;  %s1117_s11 = scalar_lea.vmem %s775_s1, 64  ;;  %p1122_p11 = scmp.lt.s32.totalorder %s775_s1, %s775_s1 }
  0x49   :  { %905 = vmatpush3.bf16.msra.mxu1 %v993_v10  ;;  %368 = vmatpush1.bf16.msra.mxu0 %v997_v14  ;;  %v284_v5 = vrot.slane %v274_v4, %v283_v3  ;;  %p1118_p10 = scmp.ne.s32.totalorder %s775_s1, %s1117_s11  ;;  %p1123_p12 = scmp.lt.s32.totalorder %s1117_s11, %s1117_s11 }
  0x4a   :  { %906 = vmatprep.subr.bf16.mxu1 %v1150_v0  ;;  %369 = vmatprep.subr.bf16.mxu0 %v1002_v16 }
  0x4b   :  { %399 = vmatprep.mubr.bf16.mxu0 %v1152_v39  ;;  %v415_v15 = vld [vmem:[#allocation2] sm:$0xff]  ;;  %v1044_v39 = vld [vmem:[#allocation8 + $0x1a0] ss:$28 sps:$4 sm:$0xff]   ;;  %p1124_p13 = por %p1123_p12, %p1122_p11 }
  0x4d   :  { %907 = vmatpush3.bf16.msra.mxu1 %v994_v11  ;;  %370 = vmatpush1.bf16.msra.mxu0 %v1000_v17  ;;  %p1125_p0 = pnand %p1124_p13, %p1118_p10 }
  0x4e   :  { %908 = vmatprep.subr.bf16.mxu1 %v1150_v0  ;;  %371 = vmatprep.subr.bf16.mxu0 %v1005_v18 }
  0x51   :  { %909 = vmatpush3.bf16.msra.mxu1 %v995_v12  ;;  %372 = vmatpush1.bf16.msra.mxu0 %v1003_v19 }
  0x52   :  { %910 = vmatprep.subr.bf16.mxu1 %v1150_v0  ;;  %373 = vmatprep.subr.bf16.mxu0 %v1008_v20 }
  0x55   :  { %911 = vmatpush3.bf16.msra.mxu1 %v996_v13  ;;  %374 = vmatpush1.bf16.msra.mxu0 %v1006_v21  ;;  %v279_v13 = vsub.s32 0, %v278_v2  ;;  %v1035_v21 = vld [vmem:[#allocation8 + $0x164] ss:$28 sps:$4 sm:$0xff]  }
  0x56   :  { %916 = vmatprep.subr.bf16.mxu1 %v1150_v0  ;;  %375 = vmatprep.subr.bf16.mxu0 %v1011_v22  ;;  %v1036_v22 = vld [vmem:[#allocation8 + $0x19c] ss:$28 sps:$4 sm:$0xff]  }
  0x57   :  { %v280_v14 = vrot.slane %v274_v4, %v279_v13 }
  0x59   :  { %376 = vmatpush1.bf16.msra.mxu0 %v1009_v23  ;;  %v1037_v23 = vld [vmem:[#allocation8 + $0x18] ss:$28 sps:$4 sm:$0xff]  }
  0x5a   :  { %377 = vmatprep.subr.bf16.mxu0 %v1014_v24  ;;  %v1038_v24 = vld [vmem:[#allocation8 + $0x50] ss:$28 sps:$4 sm:$0xff]  }
  0x5d   :  { %378 = vmatpush1.bf16.msra.mxu0 %v1012_v25  ;;  %v1039_v25 = vld [vmem:[#allocation8 + $0x88] ss:$28 sps:$4 sm:$0xff]  }
  0x5e   :  { %379 = vmatprep.subr.bf16.mxu0 %v1017_v35 }
  0x61   :  { %380 = vmatpush1.bf16.msra.mxu0 %v1015_v36 }
  0x62   :  { %381 = vmatprep.subr.bf16.mxu0 %v1020_v37 }
  0x65   :  { %382 = vmatpush1.bf16.msra.mxu0 %v1018_v38  ;;  %v1043_v38 = vld [vmem:[#allocation8 + $0x168] ss:$28 sps:$4 sm:$0xff]  }
  0x66   :  { %936 = vmatprep.subr.bf16.mxu0 %v1150_v0 }
 0x11b   :  { %v134_v27 = vpop.f32.mrb[0].mxu0 }
 0x11c   :  { %v135_v28 = vadd.f32 %v784_v26, %v134_v27  ;;  %v894_v29 = vpop.f32.mrb[1].mxu0  ;;  %v1040_v26 = vld [vmem:[#allocation8 + $0xc0] ss:$28 sps:$4 sm:$0xff]   ;;  %v1041_v27 = vld [vmem:[#allocation8 + $0xf8] ss:$28 sps:$4 sm:$0xff]  }
 0x11d   :  { %v137_v30 = vpop.f32.mrb[2].mxu0  ;;  %v815_v29 = vld [vmem:[%s1295_s3 + $0x4] ss:$0 sm:$0xff] }
 0x11e   :  { %vm140_vm2 = vcmp.gt.f32.partialorder %v135_v28, 0.0  ;;  %v141_v31 = vmul.f32 0.2, %v135_v28  ;;  %v895_v32 = vpop.f32.mrb[3].mxu0 }
 0x120   :  { %v142_v33 = vsel %vm140_vm2, %v135_v28, %v141_v31  ;;  %v1042_v28 = vld [vmem:[#allocation8 + $0x130] ss:$28 sps:$4 sm:$0xff]  }
 0x121   :  { %v160_v34 = vpack.c.bf16 %v142_v33, %v142_v33 }
 0x123   :  { %913 = vmatmul.mubr.bf16.vlgmr.msra.gmra.mrb[0].mxu1 %v160_v34 }
 0x124   :  { %932 = vmatprep.mubr.msk.bf16.mxu1 %vm1151_vm0, %v1150_v0  ;;  %917 = vmatpush3.bf16.msra.mxu1 %v1021_v40  ;;  %v824_v40 = vld [vmem:[%s1295_s3 + $0x5] ss:$0 sm:$0xff] }
 0x125   :  { %918 = vmatprep.subr.bf16.mxu1 %v1150_v0 }
 0x128   :  { %919 = vmatpush3.bf16.msra.mxu1 %v1022_v41 }
 0x129   :  { %920 = vmatprep.subr.bf16.mxu1 %v1150_v0 }
 0x12c   :  { %921 = vmatpush3.bf16.msra.mxu1 %v1023_v51 }
 0x12d   :  { %922 = vmatprep.subr.bf16.mxu1 %v1150_v0 }
 0x130   :  { %923 = vmatpush3.bf16.msra.mxu1 %v1024_v52 }
 0x131   :  { %924 = vmatprep.subr.bf16.mxu1 %v1150_v0 }
 0x134   :  { %925 = vmatpush3.bf16.msra.mxu1 %v1025_v53 }
 0x135   :  { %926 = vmatprep.subr.bf16.mxu1 %v1150_v0 }
 0x138   :  { %927 = vmatpush3.bf16.msra.mxu1 %v1026_v55 }
 0x139   :  { %928 = vmatprep.subr.bf16.mxu1 %v1150_v0 }
 0x13c   :  { %929 = vmatpush3.bf16.msra.mxu1 %v1027_v56 }
 0x13d   :  { %930 = vmatprep.subr.bf16.mxu1 %v1150_v0 }
 0x140   :  { %931 = vmatpush3.bf16.msra.mxu1 %v1028_v57 }
 0x141   :  { %956 = vmatprep.subr.bf16.mxu1 %v1150_v0 }
 0x1f6   :  { %v249_v43 = vpop.f32.mrb[0].mxu1 }
 0x1f7   :  { %v250_v44 = vadd.f32 %v790_v42, %v249_v43  ;;  %v914_v45 = vpop.f32.mrb[1].mxu1 }
 0x1f8   :  { %v252_v46 = vpop.f32.mrb[2].mxu1 }
 0x1f9   :  { %vm255_vm3 = vcmp.gt.f32.partialorder %v250_v44, 0.0  ;;  %v256_v47 = vmul.f32 0.2, %v250_v44  ;;  %v915_v48 = vpop.f32.mrb[3].mxu1 }
 0x1fb   :  { %v257_v49 = vsel %vm255_vm3, %v250_v44, %v256_v47 }
 0x1fc   :  { %v275_v50 = vpack.c.bf16 %v257_v49, %v257_v49 }
 0x1fe   :  { %400 = vmatmul.mubr.bf16.vlgmr.msra.gmra.mrb[4].mxu0 %v275_v50 }
 0x1ff   :  { %952 = vmatprep.mubr.msk.bf16.mxu0 %vm1151_vm0, %v1150_v0  ;;  %937 = vmatpush3.bf16.msra.mxu0 %v1029_v58 }
 0x200   :  { %938 = vmatprep.subr.bf16.mxu0 %v1150_v0 }
 0x203   :  { %939 = vmatpush3.bf16.msra.mxu0 %v1030_v59 }
 0x204   :  { %940 = vmatprep.subr.bf16.mxu0 %v1150_v0 }
 0x207   :  { %941 = vmatpush3.bf16.msra.mxu0 %v1031_v60 }
 0x208   :  { %942 = vmatprep.subr.bf16.mxu0 %v1150_v0 }
 0x20b   :  { %943 = vmatpush3.bf16.msra.mxu0 %v1032_v61 }
 0x20c   :  { %944 = vmatprep.subr.bf16.mxu0 %v1150_v0 }
 0x20f   :  { %945 = vmatpush3.bf16.msra.mxu0 %v1033_v62 }
 0x210   :  { %946 = vmatprep.subr.bf16.mxu0 %v1150_v0 }
 0x213   :  { %947 = vmatpush3.bf16.msra.mxu0 %v1034_v63 }
 0x214   :  { %948 = vmatprep.subr.bf16.mxu0 %v1150_v0 }
 0x217   :  { %949 = vmatpush3.bf16.msra.mxu0 %v1035_v21 }
 0x218   :  { %950 = vmatprep.subr.bf16.mxu0 %v1150_v0 }
 0x21b   :  { %951 = vmatpush3.bf16.msra.mxu0 %v1036_v22 }
 0x2d1   :  { %v401_v6 = vpop.f32.mrb[4].mxu0 }
 0x2d2   :  { %v403_v7 = vpop.f32.mrb[5].mxu0  ;;  %v402_v17 = vadd.f32 %v401_v6, %v280_v14 }
 0x2d3   :  { %v404_v8 = vadd.f32 %v403_v7, %v284_v5  ;;  %v405_v9 = vpop.f32.mrb[6].mxu0 }
 0x2d4   :  { %v406_v10 = vpop.f32.mrb[7].mxu0 }
 0x2d5   :  { %v412_v11 = vmul.f32 0.5, %v404_v8 }
 0x2d7   :  { %v413_v12 = vmul.f32 1.442695, %v412_v11 }
 0x2d9   :  { %1045 = vpow2.f32 %v413_v12 }
 0x2e3   :  { %v1046_v16 = vpop.eup %1045 }
 0x2e4   :  { %v416_v18 = vmul.f32 %v1046_v16, %v415_v15 }
 0x2e6   :  { %v417_v19 = vadd.f32 %v416_v18, %v402_v17 }
 0x2e8   :  { %v435_v20 = vpack.c.bf16 %v417_v19, %v417_v19 }
 0x2ea   :  { %933 = vmatmul.mubr.bf16.vlgmr.msra.gmra.mrb[4].mxu1 %v435_v20 }
 0x2eb   :  { %972 = vmatprep.mubr.msk.bf16.mxu1 %vm1151_vm0, %v1150_v0  ;;  %957 = vmatpush3.bf16.msra.mxu1 %v1037_v23 }
 0x2ec   :  { %958 = vmatprep.subr.bf16.mxu1 %v1150_v0 }
 0x2ef   :  { %959 = vmatpush3.bf16.msra.mxu1 %v1038_v24 }
 0x2f0   :  { %960 = vmatprep.subr.bf16.mxu1 %v1150_v0 }
 0x2f3   :  { %961 = vmatpush3.bf16.msra.mxu1 %v1039_v25 }
 0x2f4   :  { %962 = vmatprep.subr.bf16.mxu1 %v1150_v0 }
 0x2f7   :  { %963 = vmatpush3.bf16.msra.mxu1 %v1040_v26 }
 0x2f8   :  { %964 = vmatprep.subr.bf16.mxu1 %v1150_v0 }
 0x2fb   :  { %965 = vmatpush3.bf16.msra.mxu1 %v1041_v27 }
 0x2fc   :  { %966 = vmatprep.subr.bf16.mxu1 %v1150_v0 }
 0x2ff   :  { %967 = vmatpush3.bf16.msra.mxu1 %v1042_v28 }
 0x300   :  { %968 = vmatprep.subr.bf16.mxu1 %v1150_v0 }
 0x303   :  { %969 = vmatpush3.bf16.msra.mxu1 %v1043_v38 }
 0x304   :  { %970 = vmatprep.subr.bf16.mxu1 %v1150_v0  ;;  %v833_v0 = vld [vmem:[%s1295_s3 + $0x6] ss:$0 sm:$0xff] }
 0x307   :  { %971 = vmatpush3.bf16.msra.mxu1 %v1044_v39 }
 0x3bd   :  { %v524_v30 = vpop.f32.mrb[4].mxu1 }
 0x3be   :  { %v525_v31 = vadd.f32 %v815_v29, %v524_v30  ;;  %v934_v32 = vpop.f32.mrb[5].mxu1 }
 0x3bf   :  { %v527_v33 = vpop.f32.mrb[6].mxu1 }
 0x3c0   :  { %vm530_vm5 = vcmp.gt.f32.partialorder %v525_v31, 0.0  ;;  %v531_v34 = vmul.f32 0.2, %v525_v31  ;;  %v935_v35 = vpop.f32.mrb[7].mxu1 }
 0x3c2   :  { %v532_v36 = vsel %vm530_vm5, %v525_v31, %v531_v34 }
 0x3c3   :  { %v550_v37 = vpack.c.bf16 %v532_v36, %v532_v36 }
 0x3c5   :  { %953 = vmatmul.mubr.bf16.vlgmr.msra.gmra.mrb[8].mxu0 %v550_v37 }
 0x498   :  { %v639_v41 = vpop.f32.mrb[8].mxu0 }
 0x499   :  { %v640_v42 = vadd.f32 %v824_v40, %v639_v41  ;;  %v954_v43 = vpop.f32.mrb[9].mxu0 }
 0x49a   :  { %v642_v44 = vpop.f32.mrb[10].mxu0 }
 0x49b   :  { %vm645_vm6 = vcmp.gt.f32.partialorder %v640_v42, 0.0  ;;  %v646_v45 = vmul.f32 0.2, %v640_v42  ;;  %v955_v46 = vpop.f32.mrb[11].mxu0 }
 0x49d   :  { %v647_v47 = vsel %vm645_vm6, %v640_v42, %v646_v45 }
 0x49e   :  { %v665_v48 = vpack.c.bf16 %v647_v47, %v647_v47 }
 0x4a0   :  { %973 = vmatmul.mubr.bf16.vlgmr.msra.gmra.mrb[8].mxu1 %v665_v48 }
 0x573   :  { %v754_v49 = vpop.f32.mrb[8].mxu1 }
 0x574   :  { %v755_v50 = vadd.f32 %v833_v0, %v754_v49  ;;  %v974_v51 = vpop.f32.mrb[9].mxu1 }
 0x575   :  { %v757_v52 = vpop.f32.mrb[10].mxu1 }
 0x576   :  { %v842_v53 = vmul.f32 -1.442695, %v755_v50  ;;  %v975_v54 = vpop.f32.mrb[11].mxu1 }
 0x578   :  { %1047 = vpow2.f32 %v842_v53 }
 0x582   :  { %v1048_v55 = vpop.eup %1047 }
 0x583   :  { %v763_v56 = vadd.f32 1.0, %v1048_v55 }
 0x585   :  { %1049 = vrcp.f32 %v763_v56 }
 0x58f   :  { %v1050_v57 = vpop.eup %1049 }
 0x590   :  { %v766_v58 = vpack.c.bf16 %v1050_v57, %v1050_v57 }
 0x592   :  { %767 = vst [vmem:[#allocation9] sm:$0xf] %v766_v58 }
 0x593   :  { %1128 = shalt.err (!%p1125_p0)
}
 0x594   :  { %s1129_s13 = scalar_lea.hbm %s1296_s4, 64 }
 0x595   :  { %p1130_p1 = scmp.ne.s32.totalorder %s1296_s4, %s1129_s13  ;;  %p1133_p2 = scmp.lt.u32.totalorder %s1129_s13, %s1296_s4 }
 0x597   :  { %p1135_p3 = pnand %p1133_p2, %p1130_p1 }
 0x599   :  { %1138 = shalt.err (!%p1135_p3)
}
 0x59a   :  { %777 = dma.vmem_to_hbm [thread:$0]  %s775_s1, 64, %s1296_s4, [#allocation5]  }
 0x59b   :  { %1143 = dma.done.wait [#allocation5], 64  }
 0x59c   :  { %1144 = vsyncadd [#allocation5], 4294967232 }
 0x59d   :  { %781 = vsyncpa [#allocation4], 1 }
 0x59e   :  { %782 = vsyncpa [#allocation7], 1 }
 0x59f   :  { %783 = vsyncpa [#allocation5], 1 }

</bundles_post_ra>
